<compile_context>
chip_gen: v5e
topology: v5e:2x2
jax: 0.10.0
libtpu: 0.0.40
codegen_flags: <defaults>
</compile_context>

<pallas_src>
import functools

import jax
import jax.numpy as jnp
from jax.experimental import pallas as pl
from jax.experimental.pallas import tpu as pltpu


def _scale_predictor_kernel(feat_ref, w_ref, b_ref, out_ref):
    x = feat_ref[...]            # (TB, nz)
    w = w_ref[...]               # (3, nz)  PyTorch Linear layout, VMEM-resident
    b = b_ref[...]               # (1, 3)   bias + 1 (folded on host)
    # (TB, 3) = x @ w.T, contraction over nz, f32 accumulate.  Kernel is
    # HBM-bound (~1.4 flop/byte), so MXU shape/precision is not a perf concern;
    # pass precision=jax.lax.Precision.HIGHEST if bit-level f32 parity with
    # PyTorch is ever required.
    y = jax.lax.dot_general(
        x, w,
        dimension_numbers=(((1,), (1,)), ((), ())),
        preferred_element_type=jnp.float32,
    )
    out_ref[...] = jnp.maximum(y + b, 0.0) + 1e-12


def _round_up(x, m):
    return ((x + m - 1) // m) * m


@functools.partial(jax.jit, static_argnames=("tb",))
def scale_predictor(feat, weight, bias, *, tb=8192):
    """feat: (B, nz) f32; weight: (3, nz) f32 (PyTorch layout); bias: (3,).

    Returns (B, 3), matching ScalePredictor.forward.
    """
    B, nz = feat.shape
    assert weight.shape == (3, nz) and bias.shape == (3,)

    # Fold the "+1" into the bias on the host (tiny, fused by XLA).
    b_fold = (bias.astype(jnp.float32) + 1.0).reshape(1, 3)

    # --- Tile-size selection -------------------------------------------------
    # Small batches: one full-array block (exempt from the (8,128) rule).
    # Large batches: aim for >=4 grid steps (v7x megacore + DMA pipelining),
    # never drop below TB_MIN rows/step (fixed per-step overhead would
    # dominate), never exceed `tb` (bounds the lane-padded VMEM footprint).
    TB_MIN = 512
    if B <= TB_MIN:
        TB = B
    else:
        TB = min(tb, _round_up(pl.cdiv(B, 4), 8))
        TB = max(TB, TB_MIN)
    grid = (pl.cdiv(B, TB),)

    # Lane-padded VMEM footprint: both the (TB, nz) feat block and the (TB, 3)
    # out block pad their last dim to 128 lanes (~512 B/row each), and each is
    # double-buffered.  Give ~1.5x headroom; clamp to [16 MiB, 56 MiB].
    vmem_need = 2 * 2 * TB * 128 * 4 + (1 << 20)
    vmem_limit = min(max(vmem_need + vmem_need // 2, 16 << 20), 56 << 20)

    return pl.pallas_call(
        _scale_predictor_kernel,
        out_shape=jax.ShapeDtypeStruct((B, 3), jnp.float32),
        grid=grid,
        in_specs=[
            pl.BlockSpec((TB, nz), lambda i: (i, 0)),   # feat tile, pipelined
            pl.BlockSpec((3, nz), lambda i: (0, 0)),    # weight, VMEM-resident
            pl.BlockSpec((1, 3), lambda i: (0, 0)),     # bias+1, VMEM-resident
        ],
        # PyTorch (B, 3) orientation written directly; no transpose pass.
        out_specs=pl.BlockSpec((TB, 3), lambda i: (i, 0)),
        compiler_params=pltpu.CompilerParams(
            dimension_semantics=("parallel",),
            vmem_limit_bytes=vmem_limit,
        ),
    )(feat, weight, b_fold)


def scale_predictor_ref(feat, weight, bias):
    y = feat @ weight.T + bias + 1.0
    return jnp.maximum(y, 0.0) + 1e-12


if __name__ == "__main__":
    nz = 32
    key = jax.random.PRNGKey(0)
    k_feat, k_w, k_b, k_feat2 = jax.random.split(key, 4)

    # Deterministic parameter init mimicking nn.Linear default:
    # U(-1/sqrt(nz), 1/sqrt(nz)) for both weight (3, nz) and bias (3,).
    bound = 1.0 / jnp.sqrt(jnp.float32(nz))
    weight = jax.random.uniform(k_w, (3, nz), jnp.float32, -bound, bound)
    bias = jax.random.uniform(k_b, (3,), jnp.float32, -bound, bound)

    # Small shape consistent with the module (batch of latent codes).
    B = 2
    feat = jax.random.normal(k_feat, (B, nz), jnp.float32)
    out = jax.block_until_ready(scale_predictor(feat, weight, bias))
    ref = scale_predictor_ref(feat, weight, bias)
    assert out.shape == (B, 3)
    assert jnp.allclose(out, ref, atol=1e-5, rtol=1e-5)

    # Larger batch exercising the tiled, parallel-grid path with a ragged tail
    # (pad-free: Pallas clips the partial last block).
    B2 = 2500
    feat2 = jax.random.normal(k_feat2, (B2, nz), jnp.float32)
    out2 = jax.block_until_ready(scale_predictor(feat2, weight, bias))
    ref2 = scale_predictor_ref(feat2, weight, bias)
    assert out2.shape == (B2, 3)
    assert jnp.allclose(out2, ref2, atol=1e-5, rtol=1e-5)

    print("KERNEL_OK")
</pallas_src>

<mosaic_0001>
module attributes {stable_mosaic.version = 11 : i64} {
  func.func @_scale_predictor_kernel(%arg0: i32, %arg1: memref<2x32xf32, #tpu.memory_space<vmem>>, %arg2: memref<3x32xf32, #tpu.memory_space<vmem>>, %arg3: memref<1x3xf32, #tpu.memory_space<vmem>>, %arg4: memref<2x3xf32, #tpu.memory_space<vmem>>) attributes {dimension_semantics = [#tpu.dimension_semantics<parallel>], iteration_bounds = array<i64: 1>, scalar_prefetch = 0 : i64, scratch_operands = 0 : i64, tpu.core_type = #tpu.core_type<tc>, window_params = [{transform_indices = @transform_0, window_bounds = array<i64: 2, 32>}, {pipeline_mode = #tpu.pipeline_mode<synchronous>, transform_indices = @transform_1, window_bounds = array<i64: 3, 32>}, {pipeline_mode = #tpu.pipeline_mode<synchronous>, transform_indices = @transform_2, window_bounds = array<i64: 1, 3>}, {transform_indices = @transform_3, window_bounds = array<i64: 2, 3>}]} {
    %c0 = arith.constant 0 : index
    %c0_0 = arith.constant 0 : index
    %0 = vector.load %arg1[%c0, %c0_0] : memref<2x32xf32, #tpu.memory_space<vmem>>, vector<2x32xf32>
    %c0_1 = arith.constant 0 : index
    %c0_2 = arith.constant 0 : index
    %1 = vector.load %arg2[%c0_1, %c0_2] : memref<3x32xf32, #tpu.memory_space<vmem>>, vector<3x32xf32>
    %c0_3 = arith.constant 0 : index
    %c0_4 = arith.constant 0 : index
    %2 = vector.load %arg3[%c0_3, %c0_4] : memref<1x3xf32, #tpu.memory_space<vmem>>, vector<1x3xf32>
    %cst = arith.constant dense<0.000000e+00> : vector<2x3xf32>
    %3 = tpu.matmul %0, %1, %cst {dimension_numbers = #tpu.dot_dimension_numbers<[1], [1], [0], [0], [0, 0, 1, 0], [], []>} : vector<2x32xf32>, vector<3x32xf32>, vector<2x3xf32> -> vector<2x3xf32>
    %4 = vector.broadcast %2 : vector<1x3xf32> to vector<2x3xf32>
    %5 = arith.addf %3, %4 : vector<2x3xf32>
    %cst_5 = arith.constant 0.000000e+00 : f32
    %6 = vector.broadcast %cst_5 : f32 to vector<2x3xf32>
    %7 = arith.maximumf %5, %6 : vector<2x3xf32>
    %cst_6 = arith.constant 9.99999996E-13 : f32
    %8 = vector.broadcast %cst_6 : f32 to vector<2x3xf32>
    %9 = arith.addf %7, %8 : vector<2x3xf32>
    %c0_7 = arith.constant 0 : index
    %c0_8 = arith.constant 0 : index
    %10 = vector.load %arg4[%c0_7, %c0_8] : memref<2x3xf32, #tpu.memory_space<vmem>>, vector<2x3xf32>
    tpu.vector_store %arg4[%c0_7, %c0_8], %9 {strides = array<i32>} : memref<2x3xf32, #tpu.memory_space<vmem>>, vector<2x3xf32>,
    return
  }
  func.func @transform_0(%arg0: i32) -> (i32, i32) {
    %c0_i32 = arith.constant 0 : i32
    %c0_i32_0 = arith.constant 0 : i32
    return %arg0, %c0_i32 : i32, i32
  }
  func.func @transform_1(%arg0: i32) -> (i32, i32) {
    %c0_i32 = arith.constant 0 : i32
    %c0_i32_0 = arith.constant 0 : i32
    %c0_i32_1 = arith.constant 0 : i32
    return %c0_i32, %c0_i32_0 : i32, i32
  }
  func.func @transform_2(%arg0: i32) -> (i32, i32) {
    %c0_i32 = arith.constant 0 : i32
    %c0_i32_0 = arith.constant 0 : i32
    %c0_i32_1 = arith.constant 0 : i32
    return %c0_i32, %c0_i32_0 : i32, i32
  }
  func.func @transform_3(%arg0: i32) -> (i32, i32) {
    %c0_i32 = arith.constant 0 : i32
    %c0_i32_0 = arith.constant 0 : i32
    return %arg0, %c0_i32 : i32, i32
  }
}

</mosaic_0001>

<bundles_post_ra>
// kernel: scale_predictor.1
= control target key start
LH: loop header
LB: loop body
LE: loop exit
PB: predicated region body
PF: predicated region fallthrough
CT: control target
= control target key end

     0   :  { %8 = vsyncpa [#allocation3], 0  ;;  %s174_s0 = inlined_call_operand.vmem [shape: f32[2,32], index: 0, kind: input, shape index: {}]   ;;  %s175_s1 = inlined_call_operand.hbm [shape: f32[3,32], index: 1, kind: input, shape index: {}]   ;;  %s176_s2 = inlined_call_operand.vmem [shape: f32[1,3], index: 2, kind: input, shape index: {}]   ;;  %s177_s3 = inlined_call_operand.hbm [shape: f32[2,3], index: 3, kind: output, shape index: {}]  }
   0x1   :  { %9 = vsyncpa [#allocation4], 0  ;;  %s17_s14 = sshll.u32 %s175_s1, 4  ;;  %s140_s15 = smov [#allocation2]   ;;  %s18_s14 = int_to_ptr.hbm [resolvable:$true] %s17_s14 }
   0x2   :  { %s19_s16 = sshll.u32 %s140_s15, 4  ;;  %s20_s16 = int_to_ptr.vmem [resolvable:$true] %s19_s16 }
   0x3   :  { %22 = dma.hbm_to_vmem [thread:$0]  %s18_s14, 64, %s20_s16, [#allocation3]  }
   0x4   :  { %136 = dma.done.wait [#allocation3], 64  }
   0x5   :  { %137 = vsyncadd [#allocation3], 4294967232  ;;  %vm35_vm0 = vcmask 261120   ;;  %v30_v0 = vld [vmem:[#allocation2] sm:$0x7]  ;;  %s141_s1 = smov [#allocation5]  }
   0x6   :  { %83 = vmatpush.xpose.msk.msra.mxu0 %vm35_vm0, %v30_v0  ;;  %v29_v1 = vld [vmem:[%s174_s0] sm:$0x3]  ;;  %s71_s21 = sshll.u32 %s141_s1, 4  ;;  %s73_s24 = sshll.u32 %s177_s3, 4  ;;  %vm64_vm1 = vcmask 17408   ;;  %s72_s21 = int_to_ptr.vmem [resolvable:$true] %s71_s21  ;;  %s74_s24 = int_to_ptr.hbm [resolvable:$true] %s73_s24 }
   0x7   :  { %v87_v2 = vld [vmem:[%s176_s2] ss:$0 sm:$0xff] }
   0x9   :  { %84 = vmatmul.msk.f32.vlgmr.msra.gmra.mxu0 %vm35_vm0, %v29_v1 }
  0x86   :  { %v59_v3 = vpop.f32.mrf.mxu0 }
  0x87   :  { %v60_v4 = vadd.f32 %v87_v2, %v59_v3 }
  0x89   :  { %v62_v5 = vmax.f32 %v60_v4, 0.0 }
  0x8b   :  { %v63_v6 = vadd.f32 1e-12, %v62_v5 }
  0x8d   :  { %65 = vst.msk [vmem:[#allocation5] sm:$0x3] %vm64_vm1, %v63_v6 }
  0x8e   :  { %76 = dma.vmem_to_hbm [thread:$0]  %s72_s21, 32, %s74_s24, [#allocation4]  }
  0x8f   :  { %138 = dma.done.wait [#allocation4], 32  }
  0x90   :  { %139 = vsyncadd [#allocation4], 4294967264 }
  0x91   :  { %81 = vsyncpa [#allocation3], 1 }
  0x92   :  { %82 = vsyncpa [#allocation4], 1 }

</bundles_post_ra>
